<compile_context>
chip_gen: v6e
topology: v6e:2x2x1
jax: 0.10.0
libtpu: 0.0.40
codegen_flags: <defaults>
</compile_context>

<pallas_src>
import jax
import jax.numpy as jnp
from jax import lax
from jax.experimental import pallas as pl
from jax.experimental.pallas import tpu as pltpu


def _round_up(v: int, m: int) -> int:
    return ((v + m - 1) // m) * m


def _vmem_capacity_bytes() -> int:
    try:
        return int(pltpu.get_tpu_info().vmem_capacity_bytes)
    except Exception:
        return 64 << 20  # conservative (v7x-sized) fallback


def _pick_tiles(B: int, Out: int, In: int):
    """Generation-aware tile sizes + scoped-VMEM limit."""
    vmem = _vmem_capacity_bytes()
    if vmem >= (96 << 20):
        # v5e / v6e: 128 MiB physical VMEM. Go big; raise the scoped limit
        # (defaults of 16/32 MiB would reject ~18 MiB of double-buffered tiles).
        tm_cap, tn_cap, tk_cap = 512, 512, 2048
        vmem_limit = 64 << 20
        two_core = False
    else:
        # v7x: 64 MiB per TensorCore. Keep the double-buffered footprint
        # ~<=20 MiB so the compiler retains pipelining headroom.
        tm_cap, tn_cap, tk_cap = 256, 512, 2048
        vmem_limit = 40 << 20
        two_core = True

    tm = min(tm_cap, _round_up(B, 8))
    tn = min(tn_cap, _round_up(Out, 128))
    tk = min(tk_cap, _round_up(In, 128))

    # v7x has 2 TensorCores sharded over the "parallel" grid axes: if the whole
    # batch fits in a single tm block, split Out into >=2 tn blocks (still a
    # multiple of 128) so one core doesn't idle.
    if two_core:
        out128 = _round_up(Out, 128)
        if _round_up(B, tm) // tm == 1 and out128 >= 256:
            tn = min(tn, ((out128 // 128 + 1) // 2) * 128)

    return tm, tn, tk, vmem_limit


def _matmul_kernel(x_ref, w_ref, o_ref):
    # out[i,j] (+)= x[i,k] @ w[j,k]^T, contracted on the In axis of both
    # operands (no XLU transpose). The output block index (i,j) is constant
    # across the k (reduction, last) grid axis, so o_ref stays VMEM-resident
    # and we accumulate into it directly.
    @pl.when(pl.program_id(2) == 0)
    def _():
        o_ref[...] = jnp.zeros_like(o_ref)

    o_ref[...] += lax.dot_general(
        x_ref[...],                       # (tm, tk) = (B-tile, In-tile)
        w_ref[...],                       # (tn, tk) = (Out-tile, In-tile)
        dimension_numbers=(((1,), (1,)), ((), ())),
        preferred_element_type=jnp.float32,
    )


@jax.jit
def linear_regression_forward(x, weight, lowest_para_threshold=0.0):
    """x: (B, In), weight: (Out, In) -> (B, Out), all float32 on TPU."""
    x = x.astype(jnp.float32)
    weight = weight.astype(jnp.float32)

    B, In = x.shape
    Out, In_w = weight.shape
    assert In == In_w, "feature dim mismatch"

    tm, tn, tk, vmem_limit = _pick_tiles(B, Out, In)
    Bp, Outp, Inp = _round_up(B, tm), _round_up(Out, tn), _round_up(In, tk)

    # Threshold mask hoisted out of the kernel; fused into the padded-weight
    # copy that we materialize anyway. Zero padding on the In axis contributes
    # nothing to the reduction; padded B/Out rows/cols are sliced off below.
    keep = jnp.logical_or(weight >= lowest_para_threshold,
                          weight <= -lowest_para_threshold)
    w_masked = jnp.where(keep, weight, jnp.zeros_like(weight))

    x_p = jnp.pad(x, ((0, Bp - B), (0, Inp - In)))
    w_p = jnp.pad(w_masked, ((0, Outp - Out), (0, Inp - In)))

    grid = (Bp // tm, Outp // tn, Inp // tk)

    out_p = pl.pallas_call(
        _matmul_kernel,
        out_shape=jax.ShapeDtypeStruct((Bp, Outp), jnp.float32),
        grid_spec=pltpu.PrefetchScalarGridSpec(
            num_scalar_prefetch=0,
            grid=grid,
            in_specs=[
                pl.BlockSpec((tm, tk), lambda i, j, k: (i, k)),   # x tile
                pl.BlockSpec((tn, tk), lambda i, j, k: (j, k)),   # weight tile
            ],
            out_specs=pl.BlockSpec((tm, tn), lambda i, j, k: (i, j)),
        ),
        compiler_params=pltpu.CompilerParams(
            dimension_semantics=("parallel", "parallel", "arbitrary"),
            vmem_limit_bytes=vmem_limit,
        ),
        cost_estimate=pl.CostEstimate(
            flops=2 * Bp * Inp * Outp,
            bytes_accessed=4 * (Bp * Inp + Outp * Inp + Bp * Outp),
            transcendentals=0,
        ),
    )(x_p, w_p)

    return out_p[:B, :Out]


if __name__ == "__main__":
    # Small deterministic example consistent with the module:
    # inputSize=32, outputSize=16, batch=8
    key = jax.random.PRNGKey(0)
    kx, kw = jax.random.split(key)

    batch, input_size, output_size = 8, 32, 16
    lowest_para_threshold = 0.1

    x = jax.random.normal(kx, (batch, input_size), dtype=jnp.float32)
    # Deterministic "init" mimicking torch.nn.Linear default U(-1/sqrt(In), 1/sqrt(In)).
    bound = 1.0 / jnp.sqrt(jnp.float32(input_size))
    weight = jax.random.uniform(
        kw, (output_size, input_size), dtype=jnp.float32, minval=-bound, maxval=bound
    )

    out = linear_regression_forward(x, weight, lowest_para_threshold)
    out = jax.block_until_ready(out)

    # Reference check in plain JAX (same semantics as the PyTorch forward).
    keep = jnp.logical_or(
        weight >= lowest_para_threshold, weight <= -lowest_para_threshold
    ).astype(weight.dtype)
    ref = x @ (weight * keep).T
    assert out.shape == (batch, output_size)
    assert jnp.allclose(out, ref, atol=1e-5, rtol=1e-5)

    print("KERNEL_OK")
</pallas_src>

<mosaic_0001>
module attributes {stable_mosaic.version = 11 : i64} {
  func.func @_matmul_kernel(%arg0: i32, %arg1: i32, %arg2: i32, %arg3: memref<8x128xf32, #tpu.memory_space<vmem>>, %arg4: memref<128x128xf32, #tpu.memory_space<vmem>>, %arg5: memref<8x128xf32, #tpu.memory_space<vmem>>) attributes {dimension_semantics = [#tpu.dimension_semantics<parallel>, #tpu.dimension_semantics<parallel>, #tpu.dimension_semantics<arbitrary>], iteration_bounds = array<i64: 1, 1, 1>, scalar_prefetch = 0 : i64, scratch_operands = 0 : i64, tpu.core_type = #tpu.core_type<tc>, window_params = [{transform_indices = @transform_0, window_bounds = array<i64: 8, 128>}, {transform_indices = @transform_1, window_bounds = array<i64: 128, 128>}, {transform_indices = @transform_2, window_bounds = array<i64: 8, 128>}]} {
    %c0_i32 = arith.constant 0 : i32
    %0 = arith.cmpi eq, %arg2, %c0_i32 : i32
    %1 = arith.extui %0 : i1 to i32
    %c0_i32_0 = arith.constant 0 : i32
    %2 = arith.cmpi ne, %1, %c0_i32_0 : i32
    scf.if %2 {
      %cst_8 = arith.constant 0.000000e+00 : f32
      %9 = vector.broadcast %cst_8 : f32 to vector<8x128xf32>
      %c0_9 = arith.constant 0 : index
      %c0_10 = arith.constant 0 : index
      %10 = vector.load %arg5[%c0_9, %c0_10] : memref<8x128xf32, #tpu.memory_space<vmem>>, vector<8x128xf32>
      tpu.vector_store %arg5[%c0_9, %c0_10], %9 {strides = array<i32>} : memref<8x128xf32, #tpu.memory_space<vmem>>, vector<8x128xf32>,
    } else {
    }
    %c0 = arith.constant 0 : index
    %c0_1 = arith.constant 0 : index
    %3 = vector.load %arg5[%c0, %c0_1] : memref<8x128xf32, #tpu.memory_space<vmem>>, vector<8x128xf32>
    %c0_2 = arith.constant 0 : index
    %c0_3 = arith.constant 0 : index
    %4 = vector.load %arg3[%c0_2, %c0_3] : memref<8x128xf32, #tpu.memory_space<vmem>>, vector<8x128xf32>
    %c0_4 = arith.constant 0 : index
    %c0_5 = arith.constant 0 : index
    %5 = vector.load %arg4[%c0_4, %c0_5] : memref<128x128xf32, #tpu.memory_space<vmem>>, vector<128x128xf32>
    %cst = arith.constant dense<0.000000e+00> : vector<8x128xf32>
    %6 = tpu.matmul %4, %5, %cst {dimension_numbers = #tpu.dot_dimension_numbers<[1], [1], [0], [0], [0, 0, 1, 0], [], []>} : vector<8x128xf32>, vector<128x128xf32>, vector<8x128xf32> -> vector<8x128xf32>
    %7 = arith.addf %3, %6 : vector<8x128xf32>
    %c0_6 = arith.constant 0 : index
    %c0_7 = arith.constant 0 : index
    %8 = vector.load %arg5[%c0_6, %c0_7] : memref<8x128xf32, #tpu.memory_space<vmem>>, vector<8x128xf32>
    tpu.vector_store %arg5[%c0_6, %c0_7], %7 {strides = array<i32>} : memref<8x128xf32, #tpu.memory_space<vmem>>, vector<8x128xf32>,
    return
  }
  func.func @transform_0(%arg0: i32, %arg1: i32, %arg2: i32) -> (i32, i32) {
    %c0_i32 = arith.constant 0 : i32
    return %arg0, %arg2 : i32, i32
  }
  func.func @transform_1(%arg0: i32, %arg1: i32, %arg2: i32) -> (i32, i32) {
    %c0_i32 = arith.constant 0 : i32
    return %arg1, %arg2 : i32, i32
  }
  func.func @transform_2(%arg0: i32, %arg1: i32, %arg2: i32) -> (i32, i32) {
    %c0_i32 = arith.constant 0 : i32
    return %arg0, %arg1 : i32, i32
  }
}

</mosaic_0001>

<bundles_post_ra>
// kernel: linear_regression_forward.1
= control target key start
LH: loop header
LB: loop body
LE: loop exit
PB: predicated region body
PF: predicated region fallthrough
CT: control target
= control target key end

     0   :  { %v198_v1 = vmov 0.0   ;;  %vm199_vm0 = vmmov 0   ;;  %s270_s0 = inlined_call_operand.vmem [shape: f32[8,128], index: 0, kind: input, shape index: {}]   ;;  %s271_s1 = inlined_call_operand.vmem [shape: f32[128,128], index: 1, kind: input, shape index: {}]   ;;  %s272_s2 = inlined_call_operand.hbm [shape: f32[8,128], index: 2, kind: output, shape index: {}]  }
   0x1   :  { %v34_v0 = vld [vmem:[%s271_s1 + $0x78] sm:$0xff]  ;;  %138 = vmatprep.subr.mxu0 %v198_v1  ;;  %170 = vmatprep.mubr.msk.f32.mxu0 %vm199_vm0, %v198_v1  ;;  %v33_v2 = vld [vmem:[%s271_s1 + $0x70] sm:$0xff] }
   0x2   :  { %139 = vmatpush3.xpose.msra.mxu0 %v34_v0 }
   0x3   :  { %140 = vmatprep.subr.mxu0 %v198_v1 }
   0x4   :  { %7 = vsyncpa [#allocation3], 0  ;;  %v32_v3 = vld [vmem:[%s271_s1 + $0x68] sm:$0xff]  ;;  %v31_v4 = vld [vmem:[%s271_s1 + $0x60] sm:$0xff]  ;;  %s200_s15 = smov [#allocation2]  }
   0x5   :  { %v30_v5 = vld [vmem:[%s271_s1 + $0x58] sm:$0xff]  ;;  %v29_v6 = vld [vmem:[%s271_s1 + $0x50] sm:$0xff]  ;;  %v28_v7 = vld [vmem:[%s271_s1 + $0x48] sm:$0xff]  ;;  %s113_s16 = sshll.u32 %s200_s15, 4  ;;  %s114_s16 = int_to_ptr.vmem [resolvable:$true] %s113_s16 }
   0x6   :  { %141 = vmatpush3.xpose.msra.mxu0 %v33_v2  ;;  %v27_v8 = vld [vmem:[%s271_s1 + $0x40] sm:$0xff]  ;;  %v26_v9 = vld [vmem:[%s271_s1 + $0x38] sm:$0xff]  ;;  %v25_v10 = vld [vmem:[%s271_s1 + $0x30] sm:$0xff]  ;;  %s176_s17 = scalar_lea.vmem %s114_s16, 128  ;;  %p181_p1 = scmp.lt.s32.totalorder %s114_s16, %s114_s16 }
   0x7   :  { %142 = vmatprep.subr.mxu0 %v198_v1  ;;  %v24_v11 = vld [vmem:[%s271_s1 + $0x28] sm:$0xff]  ;;  %v23_v12 = vld [vmem:[%s271_s1 + $0x20] sm:$0xff]  ;;  %v22_v13 = vld [vmem:[%s271_s1 + $0x18] sm:$0xff]  ;;  %p177_p0 = scmp.ne.s32.totalorder %s114_s16, %s176_s17  ;;  %p182_p2 = scmp.lt.s32.totalorder %s176_s17, %s176_s17 }
   0x8   :  { %v21_v14 = vld [vmem:[%s271_s1 + $0x10] sm:$0xff]  ;;  %v20_v15 = vld [vmem:[%s271_s1 + $0x8] sm:$0xff]  ;;  %v19_v16 = vld [vmem:[%s271_s1] sm:$0xff] }
   0x9   :  { %v18_v17 = vld [vmem:[%s270_s0] sm:$0xff]  ;;  %p183_p3 = por %p182_p2, %p181_p1 }
   0xa   :  { %143 = vmatpush3.xpose.msra.mxu0 %v32_v3 }
   0xb   :  { %144 = vmatprep.subr.mxu0 %v198_v1  ;;  %p184_p4 = pnand %p183_p3, %p177_p0 }
   0xe   :  { %145 = vmatpush3.xpose.msra.mxu0 %v31_v4 }
   0xf   :  { %146 = vmatprep.subr.mxu0 %v198_v1 }
  0x12   :  { %147 = vmatpush3.xpose.msra.mxu0 %v30_v5 }
  0x13   :  { %148 = vmatprep.subr.mxu0 %v198_v1 }
  0x16   :  { %149 = vmatpush3.xpose.msra.mxu0 %v29_v6 }
  0x17   :  { %150 = vmatprep.subr.mxu0 %v198_v1 }
  0x1a   :  { %151 = vmatpush3.xpose.msra.mxu0 %v28_v7 }
  0x1b   :  { %152 = vmatprep.subr.mxu0 %v198_v1 }
  0x1e   :  { %153 = vmatpush3.xpose.msra.mxu0 %v27_v8 }
  0x1f   :  { %154 = vmatprep.subr.mxu0 %v198_v1 }
  0x22   :  { %155 = vmatpush3.xpose.msra.mxu0 %v26_v9 }
  0x23   :  { %156 = vmatprep.subr.mxu0 %v198_v1 }
  0x26   :  { %157 = vmatpush3.xpose.msra.mxu0 %v25_v10 }
  0x27   :  { %158 = vmatprep.subr.mxu0 %v198_v1 }
  0x2a   :  { %159 = vmatpush3.xpose.msra.mxu0 %v24_v11 }
  0x2b   :  { %160 = vmatprep.subr.mxu0 %v198_v1 }
  0x2e   :  { %161 = vmatpush3.xpose.msra.mxu0 %v23_v12 }
  0x2f   :  { %162 = vmatprep.subr.mxu0 %v198_v1 }
  0x32   :  { %163 = vmatpush3.xpose.msra.mxu0 %v22_v13 }
  0x33   :  { %164 = vmatprep.subr.mxu0 %v198_v1 }
  0x36   :  { %165 = vmatpush3.xpose.msra.mxu0 %v21_v14 }
  0x37   :  { %166 = vmatprep.subr.mxu0 %v198_v1 }
  0x3a   :  { %167 = vmatpush3.xpose.msra.mxu0 %v20_v15 }
  0x3b   :  { %168 = vmatprep.subr.mxu0 %v198_v1 }
  0x3e   :  { %169 = vmatpush3.xpose.msra.mxu0 %v19_v16 }
  0x41   :  { %171 = vmatmul.mubr.f32.vlgmr.msra.gmra.mxu0 %v18_v17 }
 0x101   :  { %v101_v18 = vpop.f32.mrf.mxu0 }
 0x102   :  { %106 = vst [vmem:[#allocation2] sm:$0xff] %v101_v18 }
 0x103   :  { %v172_v19 = vpop.f32.mrf.mxu0 }
 0x104   :  { %187 = shalt.err (!%p184_p4)
}
 0x105   :  { %116 = dma.vmem_to_hbm [thread:$0]  %s114_s16, 128, %s272_s2, [#allocation3]  }
 0x106   :  { %196 = dma.done.wait [#allocation3], 128  }
 0x107   :  { %197 = vsyncadd [#allocation3], 4294967168 }
 0x108   :  { %120 = vsyncpa [#allocation3], 1 }

</bundles_post_ra>
